<compile_context>
chip_gen: v7x
topology: tpu7x:2x2x1
jax: 0.10.0
libtpu: 0.0.40
codegen_flags: <defaults>
</compile_context>

<pallas_src>
import functools
import math

import jax
import jax.numpy as jnp
import numpy as np
from jax.experimental import pallas as pl
from jax.experimental.pallas import tpu as pltpu


def _round_up(x, m):
    return ((x + m - 1) // m) * m


def _vmem_capacity_bytes():
    """Per-core physical VMEM; falls back to the v7x-safe 64 MiB."""
    try:
        cap = int(getattr(pltpu.get_tpu_info(), "vmem_capacity_bytes", 0))
        if cap > 0:
            return cap
    except Exception:
        pass
    return 64 * 1024 * 1024


# ---------------------------------------------------------------------------
# Kernel A: embedding table resident in VMEM -> dynamic row reads (no DMA).
# ---------------------------------------------------------------------------
def _embed_resident_kernel(ids_ref,    # SMEM (scalar prefetch), (chunk_tokens,) i32
                           vals_ref,   # VMEM (tm, 1) f32
                           wval_ref,   # VMEM (1, d) f32
                           table_ref,  # VMEM whole array (vocab, d), table dtype
                           out_ref,    # VMEM (tm, d)
                           gbuf_ref):  # VMEM scratch (tm, d), table dtype
    tm = out_ref.shape[0]
    base = pl.program_id(0) * tm

    # Per-token gather = dynamic sublane-offset VMEM reads; no DMA descriptors.
    @pl.loop(0, tm)
    def _gather(t):
        row = ids_ref[base + t]
        gbuf_ref[pl.ds(t, 1), :] = table_ref[pl.ds(row, 1), :]

    val_emb = vals_ref[...] * wval_ref[...]                 # (tm,1)*(1,d) -> (tm,d) f32
    out_ref[...] = (gbuf_ref[...].astype(jnp.float32) + val_emb).astype(out_ref.dtype)


# ---------------------------------------------------------------------------
# Kernel B: table stays in HBM -> per-row gather DMAs, chunked drain on a
# semaphore ring, add + store interleaved with the remaining in-flight DMAs.
# ---------------------------------------------------------------------------
def _embed_hbm_kernel(ids_ref,    # SMEM (scalar prefetch), (chunk_tokens,) i32
                      vals_ref,   # VMEM (tm, 1) f32
                      wval_ref,   # VMEM (1, d) f32
                      table_ref,  # HBM (pl.ANY), (vocab, d)
                      out_ref,    # VMEM (tm, d)
                      gbuf_ref,   # VMEM scratch (tm, d), table dtype
                      sem_ref,    # DMA semaphore ring, (tm // drain_chunk,)
                      *, drain_chunk):
    tm = out_ref.shape[0]
    base = pl.program_id(0) * tm
    n_chunks = tm // drain_chunk

    def row_copy(t):
        # Rebuilds the exact descriptor used at issue time, so every .wait()
        # matches its own .start() (no fake-descriptor trick).
        row = ids_ref[base + t]
        return pltpu.make_async_copy(
            table_ref.at[pl.ds(row, 1), :],
            gbuf_ref.at[pl.ds(t, 1), :],
            sem_ref.at[t // drain_chunk])

    # Issue every row gather up front so all of them are in flight at once.
    @pl.loop(0, tm)
    def _issue(t):
        row_copy(t).start()

    wv = wval_ref[...]                                       # (1, d)
    # Drain chunk by chunk: chunk c's add + store overlaps chunks > c's DMAs.
    for c in range(n_chunks):                                # static unroll
        @pl.loop(c * drain_chunk, (c + 1) * drain_chunk)
        def _drain(t):
            row_copy(t).wait()
        sl = pl.ds(c * drain_chunk, drain_chunk)
        out_ref[sl, :] = (gbuf_ref[sl, :].astype(jnp.float32)
                          + vals_ref[sl, :] * wv).astype(out_ref.dtype)


# ---------------------------------------------------------------------------
# One pallas_call over one bounded chunk of the flattened token stream.
# ---------------------------------------------------------------------------
def _embed_chunk(ids, vals2d, wval2d, table, *, tm, out_dtype,
                 use_resident, vmem_limit):
    n_chunk = ids.shape[0]
    vocab, d_model = table.shape
    grid = (n_chunk // tm,)

    in_specs = [
        pl.BlockSpec((tm, 1), lambda i, *_: (i, 0)),         # gene values
        pl.BlockSpec((1, d_model), lambda i, *_: (0, 0)),    # value-embedding weight
    ]
    out_spec = pl.BlockSpec((tm, d_model), lambda i, *_: (i, 0))

    if use_resident:
        kernel = _embed_resident_kernel
        in_specs.append(pl.BlockSpec(memory_space=pltpu.MemorySpace.VMEM))
        scratch = [pltpu.VMEM((tm, d_model), table.dtype)]
    else:
        drain_chunk = math.gcd(tm, 32)
        kernel = functools.partial(_embed_hbm_kernel, drain_chunk=drain_chunk)
        in_specs.append(pl.BlockSpec(memory_space=pl.ANY))
        scratch = [pltpu.VMEM((tm, d_model), table.dtype),
                   pltpu.SemaphoreType.DMA((tm // drain_chunk,))]

    return pl.pallas_call(
        kernel,
        out_shape=jax.ShapeDtypeStruct((n_chunk, d_model), out_dtype),
        grid_spec=pltpu.PrefetchScalarGridSpec(
            num_scalar_prefetch=1,                           # ids -> SMEM
            grid=grid,
            in_specs=in_specs,
            out_specs=out_spec,
            scratch_shapes=scratch,
        ),
        compiler_params=pltpu.CompilerParams(
            dimension_semantics=("parallel",),
            vmem_limit_bytes=int(vmem_limit),
        ),
    )(ids, vals2d, wval2d, table)


# ---------------------------------------------------------------------------
# Parameter fold (call ONCE at parameter load/update time, not per forward).
# ---------------------------------------------------------------------------
def fold_genomix_params(emb_table, w_val, w_fusion=None, *, fusion_type="add"):
    """Fold the bias-free (linear) fusion layer into the parameters.

      'add':    table' = emb_table,                   wval' = w_val
      'concat': cat([id_emb, val_emb]) @ W.T
                  = id_emb @ W[:, :d].T + (val * w_val) @ W[:, d:].T
                => table' = emb_table @ W[:, :d].T,   wval' = W[:, d:] @ w_val
    """
    d_model = emb_table.shape[1]
    if fusion_type == "add":
        return emb_table, w_val
    if fusion_type == "concat":
        assert w_fusion is not None and w_fusion.shape == (d_model, 2 * d_model)
        wf = w_fusion.astype(jnp.float32)
        out_dtype = jnp.result_type(emb_table.dtype, w_fusion.dtype)
        table = (emb_table.astype(jnp.float32) @ wf[:, :d_model].T).astype(out_dtype)
        wval = (wf[:, d_model:] @ w_val.astype(jnp.float32)).astype(out_dtype)
        return table, wval
    raise ValueError(f"Unknown fusion type: {fusion_type}")


# ---------------------------------------------------------------------------
# Forward (operates on already-folded parameters).
# ---------------------------------------------------------------------------
@functools.partial(jax.jit,
                   static_argnames=("tm", "force_path", "max_tokens_per_call"))
def genomix_tabular_embedding(gene_id, gene_val, table, wval, *,
                              tm=512, force_path="auto",
                              max_tokens_per_call=65536):
    """gene_id:(B,S) int, gene_val:(B,S) float, table:(vocab,d), wval:(d,)
       returns (B, S, d) in table.dtype."""
    B, S = gene_id.shape
    vocab, d_model = table.shape
    N = B * S
    out_dtype = table.dtype
    tbl_item = jnp.dtype(table.dtype).itemsize
    out_item = jnp.dtype(out_dtype).itemsize

    # ---- tiling (tm multiple of 32: sublane-friendly, 32-row drain chunks) --
    tm = max(32, _round_up(min(int(tm), _round_up(N, 32)), 32))
    # Bound tokens per pallas_call so scalar-prefetched ids stay small in SMEM.
    chunk_tokens = max(tm, (min(int(max_tokens_per_call), _round_up(N, tm)) // tm) * tm)
    n_calls = (N + chunk_tokens - 1) // chunk_tokens
    n_pad = n_calls * chunk_tokens

    # ---- VMEM budget / path selection ---------------------------------------
    vmem_cap = _vmem_capacity_bytes()
    table_bytes = vocab * d_model * tbl_item
    pipeline_bytes = (2 * (tm * d_model * out_item + tm * 4 + d_model * 4)
                      + tm * d_model * tbl_item)
    if force_path == "resident":
        use_resident = True
    elif force_path == "hbm":
        use_resident = False
    else:
        use_resident = (table_bytes + pipeline_bytes) <= int(0.70 * vmem_cap)
    vmem_limit = min(vmem_cap, 128 * 1024 * 1024)            # never above physical
    if not use_resident:
        vmem_limit = min(vmem_limit, max(4 * pipeline_bytes, 16 * 1024 * 1024))

    # ---- flatten / pad -------------------------------------------------------
    ids = jnp.clip(gene_id.reshape(N).astype(jnp.int32), 0, vocab - 1)
    vals = gene_val.reshape(N).astype(jnp.float32)
    if n_pad != N:
        ids = jnp.pad(ids, (0, n_pad - N))                   # padding: row 0, val 0
        vals = jnp.pad(vals, (0, n_pad - N))
    wval2d = wval.astype(jnp.float32).reshape(1, d_model)

    outs = []
    for c in range(n_calls):
        sl = slice(c * chunk_tokens, (c + 1) * chunk_tokens)
        outs.append(_embed_chunk(ids[sl], vals[sl].reshape(chunk_tokens, 1),
                                 wval2d, table, tm=tm, out_dtype=out_dtype,
                                 use_resident=use_resident,
                                 vmem_limit=vmem_limit))
    out = outs[0] if n_calls == 1 else jnp.concatenate(outs, axis=0)
    return out[:N].reshape(B, S, d_model)


# ---------------------------------------------------------------------------
# Pure-JAX reference (mirrors the PyTorch forward exactly).
# ---------------------------------------------------------------------------
def reference(gene_id, gene_val, emb_table, w_val, w_fusion=None,
              fusion_type="add"):
    id_emb = emb_table[gene_id]                              # (B, S, d)
    val_emb = gene_val[..., None] * w_val[None, None, :]     # (B, S, d)
    if fusion_type == "add":
        return id_emb + val_emb
    cat = jnp.concatenate([id_emb, val_emb], axis=-1)        # (B, S, 2d)
    return cat @ w_fusion.T                                  # (B, S, d)


# ---------------------------------------------------------------------------
if __name__ == "__main__":
    B, S = 2, 8                    # 16 tokens
    vocab_size, d_model = 64, 32

    key = jax.random.PRNGKey(0)
    k_id, k_val, k_tbl, k_wv, k_wf = jax.random.split(key, 5)

    gene_id = jax.random.randint(k_id, (B, S), 0, vocab_size, dtype=jnp.int32)
    gene_val = jax.random.normal(k_val, (B, S), dtype=jnp.float32)
    emb_table = jax.random.normal(k_tbl, (vocab_size, d_model), dtype=jnp.float32)
    w_val = jax.random.normal(k_wv, (d_model,), dtype=jnp.float32)     # Linear(1,d).weight[:,0]
    w_fusion = jax.random.normal(k_wf, (d_model, 2 * d_model), dtype=jnp.float32)

    # fusion_type='add' (module default), VMEM-resident table path
    t_add, wv_add = fold_genomix_params(emb_table, w_val, fusion_type="add")
    out_add = genomix_tabular_embedding(gene_id, gene_val, t_add, wv_add)
    jax.block_until_ready(out_add)
    ref_add = reference(gene_id, gene_val, emb_table, w_val, fusion_type="add")
    np.testing.assert_allclose(np.asarray(out_add), np.asarray(ref_add),
                               rtol=1e-5, atol=1e-5)

    # fusion_type='concat' (fusion Linear folded once, outside the jitted forward)
    t_cat, wv_cat = fold_genomix_params(emb_table, w_val, w_fusion,
                                        fusion_type="concat")
    out_cat = genomix_tabular_embedding(gene_id, gene_val, t_cat, wv_cat)
    jax.block_until_ready(out_cat)
    ref_cat = reference(gene_id, gene_val, emb_table, w_val, w_fusion,
                        fusion_type="concat")
    np.testing.assert_allclose(np.asarray(out_cat), np.asarray(ref_cat),
                               rtol=1e-4, atol=1e-4)

    # HBM-gather fallback path (chunked semaphore-ring drain), exercised explicitly
    out_hbm = genomix_tabular_embedding(gene_id, gene_val, t_add, wv_add,
                                        force_path="hbm")
    jax.block_until_ready(out_hbm)
    np.testing.assert_allclose(np.asarray(out_hbm), np.asarray(ref_add),
                               rtol=1e-5, atol=1e-5)

    print("KERNEL_OK")
</pallas_src>

<mosaic_0001>
module attributes {stable_mosaic.version = 11 : i64} {
  func.func @_embed_resident_kernel(%arg0: i32, %arg1: memref<32xi32, #tpu.memory_space<smem>>, %arg2: memref<32x1xf32, #tpu.memory_space<vmem>>, %arg3: memref<1x32xf32, #tpu.memory_space<vmem>>, %arg4: memref<64x32xf32, #tpu.memory_space<vmem>>, %arg5: memref<32x32xf32, #tpu.memory_space<vmem>>, %arg6: memref<32x32xf32, #tpu.memory_space<vmem>>) attributes {dimension_semantics = [#tpu.dimension_semantics<parallel>], iteration_bounds = array<i64: 1>, scalar_prefetch = 1 : i64, scratch_operands = 1 : i64, tpu.core_type = #tpu.core_type<tc>, window_params = [{transform_indices = @transform_0, window_bounds = array<i64: 32, 1>}, {pipeline_mode = #tpu.pipeline_mode<synchronous>, transform_indices = @transform_1, window_bounds = array<i64: 1, 32>}, {pipeline_mode = #tpu.pipeline_mode<synchronous>, transform_indices = @transform_2, window_bounds = array<i64: 64, 32>}, {transform_indices = @transform_3, window_bounds = array<i64: 32, 32>}]} {
    %c32_i32 = arith.constant 32 : i32
    %0 = arith.muli %arg0, %c32_i32 : i32
    %c0_i32 = arith.constant 0 : i32
    %c32_i32_0 = arith.constant 32 : i32
    %1 = arith.addi %c0_i32, %c32_i32_0 : i32
    %c1_i32 = arith.constant 1 : i32
    scf.for %arg7 = %c0_i32 to %1 step %c1_i32  : i32 {
      %c1_i32_9 = arith.constant 1 : i32
      %10 = arith.muli %arg7, %c1_i32_9 : i32
      %c0_i32_10 = arith.constant 0 : i32
      %11 = arith.addi %c0_i32_10, %10 : i32
      %12 = arith.addi %0, %11 : i32
      %13 = arith.index_cast %12 : i32 to index
      %14 = memref.load %arg1[%13] : memref<32xi32, #tpu.memory_space<smem>>
      %15 = arith.index_cast %14 : i32 to index
      %c0_11 = arith.constant 0 : index
      %16 = vector.load %arg4[%15, %c0_11] : memref<64x32xf32, #tpu.memory_space<vmem>>, vector<1x32xf32>
      %17 = arith.index_cast %11 : i32 to index
      %c0_12 = arith.constant 0 : index
      %18 = vector.load %arg6[%17, %c0_12] : memref<32x32xf32, #tpu.memory_space<vmem>>, vector<1x32xf32>
      tpu.vector_store %arg6[%17, %c0_12], %16 {strides = array<i32>} : memref<32x32xf32, #tpu.memory_space<vmem>>, vector<1x32xf32>,
    }
    %c32_i32_1 = arith.constant 32 : i32
    %c0 = arith.constant 0 : index
    %c0_2 = arith.constant 0 : index
    %2 = vector.load %arg2[%c0, %c0_2] : memref<32x1xf32, #tpu.memory_space<vmem>>, vector<32x1xf32>
    %c0_3 = arith.constant 0 : index
    %c0_4 = arith.constant 0 : index
    %3 = vector.load %arg3[%c0_3, %c0_4] : memref<1x32xf32, #tpu.memory_space<vmem>>, vector<1x32xf32>
    %4 = vector.broadcast %2 : vector<32x1xf32> to vector<32x32xf32>
    %5 = vector.broadcast %3 : vector<1x32xf32> to vector<32x32xf32>
    %6 = arith.mulf %4, %5 : vector<32x32xf32>
    %c0_5 = arith.constant 0 : index
    %c0_6 = arith.constant 0 : index
    %7 = vector.load %arg6[%c0_5, %c0_6] : memref<32x32xf32, #tpu.memory_space<vmem>>, vector<32x32xf32>
    %8 = arith.addf %7, %6 : vector<32x32xf32>
    %c0_7 = arith.constant 0 : index
    %c0_8 = arith.constant 0 : index
    %9 = vector.load %arg5[%c0_7, %c0_8] : memref<32x32xf32, #tpu.memory_space<vmem>>, vector<32x32xf32>
    tpu.vector_store %arg5[%c0_7, %c0_8], %8 {strides = array<i32>} : memref<32x32xf32, #tpu.memory_space<vmem>>, vector<32x32xf32>,
    return
  }
  func.func @transform_0(%arg0: i32, %arg1: memref<32xi32, #tpu.memory_space<smem>>) -> (i32, i32) {
    %c0_i32 = arith.constant 0 : i32
    %c0_i32_0 = arith.constant 0 : i32
    return %arg0, %c0_i32 : i32, i32
  }
  func.func @transform_1(%arg0: i32, %arg1: memref<32xi32, #tpu.memory_space<smem>>) -> (i32, i32) {
    %c0_i32 = arith.constant 0 : i32
    %c0_i32_0 = arith.constant 0 : i32
    %c0_i32_1 = arith.constant 0 : i32
    return %c0_i32, %c0_i32_0 : i32, i32
  }
  func.func @transform_2(%arg0: i32, %arg1: memref<32xi32, #tpu.memory_space<smem>>) -> (i32, i32) {
    %c0_i32 = arith.constant 0 : i32
    %c0_i32_0 = arith.constant 0 : i32
    %c0_i32_1 = arith.constant 0 : i32
    return %c0_i32, %c0_i32_0 : i32, i32
  }
  func.func @transform_3(%arg0: i32, %arg1: memref<32xi32, #tpu.memory_space<smem>>) -> (i32, i32) {
    %c0_i32 = arith.constant 0 : i32
    %c0_i32_0 = arith.constant 0 : i32
    return %arg0, %c0_i32 : i32, i32
  }
}

</mosaic_0001>

<bundles_post_ra>
// kernel: genomix_tabular_embedding.1
= control target key start
LH: loop header
LB: loop body
LE: loop exit
PB: predicated region body
PF: predicated region fallthrough
CT: control target
= control target key end

     0   :  { %s392_s0 = inlined_call_operand.hbm [shape: s32[32], index: 0, kind: input, shape index: {}]   ;;  %s393_s1 = inlined_call_operand.hbm [shape: f32[32,1], index: 1, kind: input, shape index: {}]   ;;  %s394_s2 = inlined_call_operand.hbm [shape: f32[1,32], index: 2, kind: input, shape index: {}]   ;;  %s395_s3 = inlined_call_operand.hbm [shape: f32[64,32], index: 3, kind: input, shape index: {}]   ;;  %s396_s4 = inlined_call_operand.hbm [shape: f32[32,32], index: 4, kind: output, shape index: {}]  }
   0x1   :  { %s165_s17 = scalar_lea.hbm %s392_s0, 16 }
   0x2   :  { %p166_p0 = scmp.ne.s32.totalorder %s392_s0, %s165_s17  ;;  %p169_p1 = scmp.lt.u32.totalorder %s165_s17, %s392_s0 }
   0x4   :  { %p171_p2 = pnand %p169_p1, %p166_p0 }
   0x6   :  { %174 = shalt.err (!%p171_p2)  }
   0x7   :  { %s279_s22 = smov [#allocation4]  }
   0x8   :  { %10 = dma.hbm_to_smem %s392_s0, 16, %s279_s22, [#allocation3] }
   0x9   :  { %267 = dma.done.wait [#allocation3], 16 }
   0xa   :  { %268 = vsyncadd [#allocation3], 4294967280 }
   0xb   :  { %12 = sfence }
   0xc   :  { %13 = vsyncpa [#allocation6], 0 }
   0xd   :  { %14 = vsyncpa [#allocation9], 0 }
   0xe   :  { %15 = vsyncpa [#allocation7], 0  ;;  %s280_s25 = smov [#allocation8]   ;;  %s281_s27 = smov [#allocation5]  }
   0xf   :  { %s34_s26 = sshll.u32 %s280_s25, 4  ;;  %s21_s28 = sshll.u32 %s281_s27, 4  ;;  %s35_s26 = int_to_ptr.vmem [resolvable:$true] %s34_s26  ;;  %s324_s28 = int_to_ptr.vmem [resolvable:$true] %s21_s28 }
  0x10   :  { %s175_s5 = scalar_lea.hbm %s394_s2, 16 }
  0x11   :  { %p176_p3 = scmp.ne.s32.totalorder %s394_s2, %s175_s5  ;;  %p179_p4 = scmp.lt.u32.totalorder %s175_s5, %s394_s2 }
  0x13   :  { %p181_p5 = pnand %p179_p4, %p176_p3 }
  0x15   :  { %184 = shalt.err (!%p181_p5)
}
  0x16   :  { %s185_s9 = scalar_lea.vmem %s35_s26, 16  ;;  %s189_s10 = scalar_lea.vmem %s35_s26, 32 }
  0x17   :  { %p186_p6 = scmp.ne.s32.totalorder %s35_s26, %s185_s9  ;;  %p190_p7 = scmp.lt.s32.totalorder %s35_s26, %s35_s26 }
  0x18   :  { %p191_p8 = scmp.lt.s32.totalorder %s189_s10, %s185_s9 }
  0x1a   :  { %p192_p9 = por %p191_p8, %p190_p7 }
  0x1c   :  { %p193_p10 = pnand %p192_p9, %p186_p6 }
  0x1e   :  { %196 = shalt.err (!%p193_p10)
}
  0x1f   :  { %37 = dma.hbm_to_vmem [thread:$0]  %s394_s2, 16, %s35_s26, [#allocation9]  }
  0x20   :  { %s197_s15 = scalar_lea.hbm %s393_s1, 512 }
  0x21   :  { %p198_p11 = scmp.ne.s32.totalorder %s393_s1, %s197_s15  ;;  %p201_p12 = scmp.lt.u32.totalorder %s197_s15, %s393_s1 }
  0x23   :  { %p203_p13 = pnand %p201_p12, %p198_p11 }
  0x25   :  { %206 = shalt.err (!%p203_p13)
}
  0x26   :  { %s207_s20 = scalar_lea.vmem %s324_s28, 512  ;;  %p212_p1 = scmp.lt.s32.totalorder %s324_s28, %s324_s28 }
  0x27   :  { %p208_p0 = scmp.ne.s32.totalorder %s324_s28, %s207_s20  ;;  %p213_p2 = scmp.lt.s32.totalorder %s207_s20, %s207_s20 }
  0x29   :  { %p214_p3 = por %p213_p2, %p212_p1 }
  0x2b   :  { %p215_p4 = pnand %p214_p3, %p208_p0 }
  0x2d   :  { %218 = shalt.err (!%p215_p4)
}
  0x2e   :  { %s282_s2 = smov 128   ;;  %s283_s21 = smov 8  }
  0x2f   :  { %27 = dma.hbm_to_vmem [thread:$0]  %s393_s1, 512, %s324_s28, [#allocation6], %s282_s2, %s282_s2, %s283_s21  }
  0x30   :  { %s284_s24 = smov [#allocation10]   ;;  %s219_s29 = scalar_lea.hbm %s395_s3, 1024 }
  0x31   :  { %s43_s25 = sshll.u32 %s284_s24, 4  ;;  %p220_p5 = scmp.ne.s32.totalorder %s395_s3, %s219_s29  ;;  %s44_s25 = int_to_ptr.vmem [resolvable:$true] %s43_s25 }
  0x32   :  { %p223_p6 = scmp.lt.u32.totalorder %s219_s29, %s395_s3 }
  0x34   :  { %p225_p7 = pnand %p223_p6, %p220_p5 }
  0x36   :  { %228 = shalt.err (!%p225_p7)
}
  0x37   :  { %s229_s0 = scalar_lea.vmem %s44_s25, 1024  ;;  %p234_p9 = scmp.lt.s32.totalorder %s44_s25, %s44_s25 }
  0x38   :  { %p230_p8 = scmp.ne.s32.totalorder %s44_s25, %s229_s0  ;;  %p235_p10 = scmp.lt.s32.totalorder %s229_s0, %s229_s0 }
  0x3a   :  { %p236_p11 = por %p235_p10, %p234_p9 }
  0x3c   :  { %p237_p12 = pnand %p236_p11, %p230_p8 }
  0x3e   :  { %240 = shalt.err (!%p237_p12)
}
  0x3f   :  { %49 = dma.hbm_to_vmem [thread:$0]  %s395_s3, 1024, %s44_s25, [#allocation9], %s282_s2, %s282_s2, %s283_s21  }
  0x40   :  { %269 = dma.done.wait [#allocation6], 512  }
  0x41   :  { %270 = vsyncadd [#allocation6], 4294966784 }
  0x42   :  { %271 = dma.done.wait [#allocation9], 1040  }
  0x43   :  { %272 = vsyncadd [#allocation9], 4294966256  ;;  %s275_s8 = smov 0  }
  0x44 LB: > { %s67_s9 = sld [smem:[#allocation4 + %s277_s8]]  ;;  %vm71_vm0 = vcmask 253952   ;;  %s70_s11 = scalar_lea.vmem [#allocation2], %s277_s8  ;;  %s277_s8 = sphi %s275_s8, %s65_s8  }
  0x45   : > { %s65_s8 = sadd.s32 1, %s277_s8  }
  0x46   : > { %p62_p13 = scmp.ge.s32.totalorder %s65_s8, 32  }
  0x47   :  { %v75_v1 = vld [vmem:[#allocation5 + $0x10] sm:$0xff] (%p62_p13)  ;;  %v73_v2 = vld [vmem:[#allocation5] sm:$0xff] (%p62_p13)  ;;  %v285_v3 = vmov (%p62_p13), 0   ;;  %v76_v4 = vld [vmem:[#allocation5 + $0x18] sm:$0xff] (%p62_p13)  ;;  %vm116_vm1 = vcmask (%p62_p13), 261120   ;;  %s286_s3 = smov (%p62_p13), [#allocation11]  }
  0x48   :  { %64 = sbr.rel (!%p62_p13) target bundleno = 68 (0x44), region = 53  ;;  %164 = vset.pattern.permute.xlu1 (%p62_p13), %v285_v3  ;;  %163 = vset.pattern.permute.xlu0 (%p62_p13), %v285_v3  ;;  %v74_v5 = vld [vmem:[#allocation5 + $0x8] sm:$0xff] (%p62_p13)  ;;  %v146_v6 = vld [vmem:[#allocation8] ss:$0 sm:$0xff] (%p62_p13)  ;;  %s126_s12 = sshll.u32 (%p62_p13), %s286_s3, 4  ;;  %s127_s12 = int_to_ptr.vmem [resolvable:$true] %s126_s12 }
  0x49   :  { %90 = vperm.xlu1 (%p62_p13), %164, %v75_v1   ;;  %80 = vperm.xlu0 (%p62_p13), %163, %v73_v2   ;;  %s241_s13 = scalar_lea.vmem (%p62_p13), %s127_s12, 512  ;;  %p246_p1 = scmp.lt.s32.totalorder (%p62_p13), %s127_s12, %s127_s12 }
  0x4a   : > { %s68_s10 = scalar_lea.vmem [#allocation10], %s67_s9  ;;  %p242_p0 = scmp.ne.s32.totalorder (%p62_p13), %s127_s12, %s241_s13 }
  0x4b   : > { %v69_v0 = vld [vmem:[%s68_s10] sm:$0x1]  ;;  %p247_p2 = scmp.lt.s32.totalorder (%p62_p13), %s241_s13, %s241_s13 }
  0x4c   : > { %72 = vst.msk [vmem:[%s70_s11] sm:$0x1] %vm71_vm0, %v69_v0 }
  0x4d   :  { %95 = vperm.xlu1 (%p62_p13), %164, %v76_v4   ;;  %85 = vperm.xlu0 (%p62_p13), %163, %v74_v5   ;;  %p248_p3 = por (%p62_p13), %p247_p2, %p246_p1 }
  0x4f   :  { %p249_p4 = pnand %p248_p3, %p242_p0 }
  0x53   :  { %v110_v7 = vld [vmem:[#allocation2 + $0x10] sm:$0xff]  ;;  %v108_v9 = vld [vmem:[#allocation2] sm:$0xff]  ;;  %v111_v15 = vld [vmem:[#allocation2 + $0x18] sm:$0xff] }
  0x54   :  { %v109_v17 = vld [vmem:[#allocation2 + $0x8] sm:$0xff] }
  0xc8   :  { %v91_v8 = vpop.permute.xlu1 %90  ;;  %v81_v10 = vpop.permute.xlu0 %80 }
  0xc9   :  { %v106_v11 = vmul.f32 %v146_v6, %v91_v8  ;;  %v104_v12 = vmul.f32 %v146_v6, %v81_v10 }
  0xcb   :  { %v114_v13 = vadd.f32 %v110_v7, %v106_v11  ;;  %v112_v14 = vadd.f32 %v108_v9, %v104_v12 }
  0xcc   :  { %v96_v16 = vpop.permute.xlu1 %95  ;;  %v86_v18 = vpop.permute.xlu0 %85 }
  0xcd   :  { %119 = vst.msk [vmem:[#allocation11 + $0x10] sm:$0xff] %vm116_vm1, %v114_v13  ;;  %117 = vst.msk [vmem:[#allocation11] sm:$0xff] %vm116_vm1, %v112_v14  ;;  %v107_v19 = vmul.f32 %v146_v6, %v96_v16  ;;  %v105_v20 = vmul.f32 %v146_v6, %v86_v18 }
  0xcf   :  { %v115_v21 = vadd.f32 %v111_v15, %v107_v19  ;;  %v113_v22 = vadd.f32 %v109_v17, %v105_v20 }
  0xd1   :  { %120 = vst.msk [vmem:[#allocation11 + $0x18] sm:$0xff] %vm116_vm1, %v115_v21  ;;  %118 = vst.msk [vmem:[#allocation11 + $0x8] sm:$0xff] %vm116_vm1, %v113_v22 }
  0xd2   :  { %252 = shalt.err (!%p249_p4)
}
  0xd3   :  { %s253_s16 = scalar_lea.hbm %s396_s4, 512 }
  0xd4   :  { %p254_p5 = scmp.ne.s32.totalorder %s396_s4, %s253_s16  ;;  %p257_p6 = scmp.lt.u32.totalorder %s253_s16, %s396_s4 }
  0xd6   :  { %p259_p7 = pnand %p257_p6, %p254_p5 }
  0xd8   :  { %262 = shalt.err (!%p259_p7)
}
  0xd9   :  { %132 = dma.vmem_to_hbm [thread:$0]  %s127_s12, 512, %s396_s4, [#allocation7], %s282_s2, %s282_s2, %s283_s21  }
  0xda   :  { %273 = dma.done.wait [#allocation7], 512  }
  0xdb   :  { %274 = vsyncadd [#allocation7], 4294966784 }
  0xdc   :  { %136 = vsyncpa [#allocation6], 1 }
  0xdd   :  { %137 = vsyncpa [#allocation9], 1 }
  0xde   :  { %138 = vsyncpa [#allocation7], 1 }

</bundles_post_ra>
